<compile_context>
chip_gen: v6e
topology: v6e:2x2x1
jax: 0.10.0
libtpu: 0.0.40
codegen_flags: <defaults>
</compile_context>

<pallas_src>
import functools

import jax
import jax.numpy as jnp
from jax import lax
from jax.experimental import pallas as pl
from jax.experimental.pallas import tpu as pltpu


def _round_up(x, m):
    return ((x + m - 1) // m) * m


def _mlp_kernel(z_ref, w1_ref, b1_ref, w2_ref, b2_ref, w3_ref, b3_ref, o_ref,
                *, mxu_dtype):
    """Fused 3-layer MLP; compute in lane-dense (features, batch) layout.

    z_ref: (TILE_B, z_dim) natural batch-major block.
    w*:    PyTorch-native (out_features, in_features); b*: (out_features, 1).
    o_ref: (TILE_B, L_dim) natural batch-major block.
    MXU operands are cast to `mxu_dtype`; accumulation and all elementwise
    math (bias add / ReLU) stay in f32 (v5e has no bf16 VPU).
    """
    z = z_ref[...]                                                     # (TB, z) f32

    # Layer 1 (NT, flash-attention style): contract z_dim of both operands
    # -> (h, TB).  Batch lands on the 128-lane axis, so everything downstream
    # is lane-dense (dense vld/vst, 4x fewer vregs for VPU math).
    h1 = lax.dot_general(
        w1_ref[...].astype(mxu_dtype), z.astype(mxu_dtype),
        (((1,), (1,)), ((), ())), preferred_element_type=jnp.float32)
    h1 = jnp.maximum(h1 + b1_ref[...], 0.0)                            # f32

    # Layer 2 (NN): (h, h) @ (h, TB) -> (h, TB)
    h2 = lax.dot_general(
        w2_ref[...].astype(mxu_dtype), h1.astype(mxu_dtype),
        (((1,), (0,)), ((), ())), preferred_element_type=jnp.float32)
    h2 = jnp.maximum(h2 + b2_ref[...], 0.0)                            # f32

    # Layer 3 (NN): (L, h) @ (h, TB) -> (L, TB)
    out = lax.dot_general(
        w3_ref[...].astype(mxu_dtype), h2.astype(mxu_dtype),
        (((1,), (0,)), ((), ())), preferred_element_type=jnp.float32)
    out = out + b3_ref[...]

    # Tiny (L_dim, TB) -> (TB, L_dim) f32 transpose on the (idle) XLU, then
    # store in the caller's natural batch-major layout.
    o_ref[...] = out.T.astype(o_ref.dtype)


def z_to_L0_forward(z_sample, params, *, tile_b=4096, mxu_dtype=jnp.bfloat16):
    """Run the fused MLP Pallas kernel.

    z_sample: (B, z_dim) float32
    params:   PyTorch-layout dict:
                w1 (h, z_dim), b1 (h, 1), w2 (h, h), b2 (h, 1),
                w3 (L_dim, h), b3 (L_dim, 1)
    mxu_dtype: dtype fed to the MXU (bf16 default; f32 for exact parity).
    returns:  (B, L_dim) float32
    """
    B, z_dim = z_sample.shape
    h_dim = params["w1"].shape[0]
    L_dim = params["w3"].shape[0]
    dtype = z_sample.dtype

    # --- batch tiling --------------------------------------------------------
    b128 = _round_up(B, 128)                       # lane granule
    tile_b = max(128, min(int(tile_b), b128))
    # v7x megacore: if the whole batch fits in one tile but halving keeps the
    # tile >= 2048 rows (per-step overhead still amortized), split into 2 grid
    # steps so both TensorCores get work.
    if tile_b >= b128 and b128 >= 2 * 2048:
        n_granules = b128 // 128
        tile_b = ((n_granules + 1) // 2) * 128
    B_pad = _round_up(B, tile_b)
    n_tiles = B_pad // tile_b

    # --- pad only when needed (skip the HBM copy for aligned batches) --------
    if B_pad != B:
        z_in = jnp.pad(z_sample, ((0, B_pad - B), (0, 0)))
    else:
        z_in = z_sample

    # Weights/biases: constant block index -> VMEM-resident across grid steps.
    const = lambda a: pl.BlockSpec(a.shape, lambda i, _nd=a.ndim: (0,) * _nd)

    flops = 2 * B_pad * (z_dim * h_dim + h_dim * h_dim + h_dim * L_dim)
    param_bytes = sum(int(p.size) * p.dtype.itemsize for p in params.values())
    bytes_accessed = B_pad * (z_dim + L_dim) * dtype.itemsize + param_bytes

    out = pl.pallas_call(
        functools.partial(_mlp_kernel, mxu_dtype=mxu_dtype),
        out_shape=jax.ShapeDtypeStruct((B_pad, L_dim), dtype),
        grid=(n_tiles,),
        in_specs=[
            pl.BlockSpec((tile_b, z_dim), lambda i: (i, 0)),   # streamed z tiles
            const(params["w1"]), const(params["b1"]),
            const(params["w2"]), const(params["b2"]),
            const(params["w3"]), const(params["b3"]),
        ],
        out_specs=pl.BlockSpec((tile_b, L_dim), lambda i: (i, 0)),
        compiler_params=pltpu.CompilerParams(
            dimension_semantics=("parallel",),      # megacore sharding on v7x
            vmem_limit_bytes=32 * 1024 * 1024,      # safe on v5e/v6e/v7x; usage is tiny
        ),
        cost_estimate=pl.CostEstimate(
            flops=flops, transcendentals=0, bytes_accessed=bytes_accessed),
    )(z_in, params["w1"], params["b1"], params["w2"], params["b2"],
      params["w3"], params["b3"])

    return out if B_pad == B else out[:B]


def init_params(key, z_dim, h_dim, L_dim, dtype=jnp.float32):
    """Deterministic synthetic init, PyTorch-native layout (bias as column)."""
    ks = jax.random.split(key, 6)
    s = 0.1
    return {
        "w1": s * jax.random.normal(ks[0], (h_dim, z_dim), dtype),
        "b1": s * jax.random.normal(ks[1], (h_dim, 1), dtype),
        "w2": s * jax.random.normal(ks[2], (h_dim, h_dim), dtype),
        "b2": s * jax.random.normal(ks[3], (h_dim, 1), dtype),
        "w3": s * jax.random.normal(ks[4], (L_dim, h_dim), dtype),
        "b3": s * jax.random.normal(ks[5], (L_dim, 1), dtype),
    }


def _reference(z, p):
    hp = jax.lax.Precision.HIGHEST
    h1 = jnp.maximum(jnp.dot(z, p["w1"].T, precision=hp) + p["b1"].T, 0.0)
    h2 = jnp.maximum(jnp.dot(h1, p["w2"].T, precision=hp) + p["b2"].T, 0.0)
    return jnp.dot(h2, p["w3"].T, precision=hp) + p["b3"].T


if __name__ == "__main__":
    # Small shapes consistent with the module config: z_dim, z_to_L_h_dim, L_dim.
    B, z_dim, h_dim, L_dim = 8, 16, 32, 8

    key = jax.random.PRNGKey(0)
    k_z, k_p, k_z2, k_z3 = jax.random.split(key, 4)
    z_sample = jax.random.normal(k_z, (B, z_dim), jnp.float32)
    params = init_params(k_p, z_dim, h_dim, L_dim)
    ref = _reference(z_sample, params)

    # 1) Exact-parity path (f32 MXU operands) vs pure-JAX reference.
    out_f32 = jax.block_until_ready(
        z_to_L0_forward(z_sample, params, mxu_dtype=jnp.float32))
    assert out_f32.shape == (B, L_dim)
    assert jnp.allclose(out_f32, ref, atol=1e-4, rtol=1e-4), "f32 path mismatch"

    # 2) Default fast path (bf16 MXU operands, f32 accumulation) — looser tol.
    out_bf16 = jax.block_until_ready(z_to_L0_forward(z_sample, params))
    assert out_bf16.shape == (B, L_dim)
    assert jnp.allclose(out_bf16, ref, atol=5e-2, rtol=5e-2), "bf16 path mismatch"

    # 3) Multi-tile grid + ragged-batch padding path (f32, tight tol).
    B2 = 389
    z2 = jax.random.normal(k_z2, (B2, z_dim), jnp.float32)
    out2 = jax.block_until_ready(
        z_to_L0_forward(z2, params, tile_b=128, mxu_dtype=jnp.float32))
    ref2 = _reference(z2, params)
    assert out2.shape == (B2, L_dim)
    assert jnp.allclose(out2, ref2, atol=1e-4, rtol=1e-4), "ragged batch mismatch"

    # 4) Megacore-split path: aligned batch that would fit one default tile is
    #    split into 2 grid steps (tile_b -> 2048) so both v7x TCs get work.
    B3 = 4096
    z3 = jax.random.normal(k_z3, (B3, z_dim), jnp.float32)
    out3 = jax.block_until_ready(z_to_L0_forward(z3, params))
    ref3 = _reference(z3, params)
    assert out3.shape == (B3, L_dim)
    assert jnp.allclose(out3, ref3, atol=5e-2, rtol=5e-2), "megacore split mismatch"

    print("KERNEL_OK")
</pallas_src>

<mosaic_0001>
module attributes {stable_mosaic.version = 11 : i64} {
  func.func @_mlp_kernel(%arg0: i32, %arg1: memref<128x16xf32, #tpu.memory_space<vmem>>, %arg2: memref<32x16xf32, #tpu.memory_space<vmem>>, %arg3: memref<32x1xf32, #tpu.memory_space<vmem>>, %arg4: memref<32x32xf32, #tpu.memory_space<vmem>>, %arg5: memref<32x1xf32, #tpu.memory_space<vmem>>, %arg6: memref<8x32xf32, #tpu.memory_space<vmem>>, %arg7: memref<8x1xf32, #tpu.memory_space<vmem>>, %arg8: memref<128x8xf32, #tpu.memory_space<vmem>>) attributes {dimension_semantics = [#tpu.dimension_semantics<parallel>], iteration_bounds = array<i64: 1>, scalar_prefetch = 0 : i64, scratch_operands = 0 : i64, tpu.core_type = #tpu.core_type<tc>, window_params = [{transform_indices = @transform_0, window_bounds = array<i64: 128, 16>}, {pipeline_mode = #tpu.pipeline_mode<synchronous>, transform_indices = @transform_1, window_bounds = array<i64: 32, 16>}, {pipeline_mode = #tpu.pipeline_mode<synchronous>, transform_indices = @transform_2, window_bounds = array<i64: 32, 1>}, {pipeline_mode = #tpu.pipeline_mode<synchronous>, transform_indices = @transform_3, window_bounds = array<i64: 32, 32>}, {pipeline_mode = #tpu.pipeline_mode<synchronous>, transform_indices = @transform_4, window_bounds = array<i64: 32, 1>}, {pipeline_mode = #tpu.pipeline_mode<synchronous>, transform_indices = @transform_5, window_bounds = array<i64: 8, 32>}, {pipeline_mode = #tpu.pipeline_mode<synchronous>, transform_indices = @transform_6, window_bounds = array<i64: 8, 1>}, {transform_indices = @transform_7, window_bounds = array<i64: 128, 8>}]} {
    %c0 = arith.constant 0 : index
    %c0_0 = arith.constant 0 : index
    %0 = vector.load %arg1[%c0, %c0_0] : memref<128x16xf32, #tpu.memory_space<vmem>>, vector<128x16xf32>
    %c0_1 = arith.constant 0 : index
    %c0_2 = arith.constant 0 : index
    %1 = vector.load %arg2[%c0_1, %c0_2] : memref<32x16xf32, #tpu.memory_space<vmem>>, vector<32x16xf32>
    %cst = arith.constant dense<0.000000e+00> : vector<32x128xf32>
    %2 = tpu.matmul %1, %0, %cst {dimension_numbers = #tpu.dot_dimension_numbers<[1], [1], [0], [0], [0, 0, 1, 0], [], []>} : vector<32x16xf32>, vector<128x16xf32>, vector<32x128xf32> -> vector<32x128xf32>
    %c0_3 = arith.constant 0 : index
    %c0_4 = arith.constant 0 : index
    %3 = vector.load %arg3[%c0_3, %c0_4] : memref<32x1xf32, #tpu.memory_space<vmem>>, vector<32x1xf32>
    %4 = vector.broadcast %3 : vector<32x1xf32> to vector<32x128xf32>
    %5 = arith.addf %2, %4 : vector<32x128xf32>
    %cst_5 = arith.constant 0.000000e+00 : f32
    %6 = vector.broadcast %cst_5 : f32 to vector<32x128xf32>
    %7 = arith.maximumf %5, %6 : vector<32x128xf32>
    %c0_6 = arith.constant 0 : index
    %c0_7 = arith.constant 0 : index
    %8 = vector.load %arg4[%c0_6, %c0_7] : memref<32x32xf32, #tpu.memory_space<vmem>>, vector<32x32xf32>
    %cst_8 = arith.constant dense<0.000000e+00> : vector<32x128xf32>
    %9 = tpu.matmul %8, %7, %cst_8 {dimension_numbers = #tpu.dot_dimension_numbers<[1], [0], [0], [1], [0, 0, 1, 1], [], []>} : vector<32x32xf32>, vector<32x128xf32>, vector<32x128xf32> -> vector<32x128xf32>
    %c0_9 = arith.constant 0 : index
    %c0_10 = arith.constant 0 : index
    %10 = vector.load %arg5[%c0_9, %c0_10] : memref<32x1xf32, #tpu.memory_space<vmem>>, vector<32x1xf32>
    %11 = vector.broadcast %10 : vector<32x1xf32> to vector<32x128xf32>
    %12 = arith.addf %9, %11 : vector<32x128xf32>
    %cst_11 = arith.constant 0.000000e+00 : f32
    %13 = vector.broadcast %cst_11 : f32 to vector<32x128xf32>
    %14 = arith.maximumf %12, %13 : vector<32x128xf32>
    %c0_12 = arith.constant 0 : index
    %c0_13 = arith.constant 0 : index
    %15 = vector.load %arg6[%c0_12, %c0_13] : memref<8x32xf32, #tpu.memory_space<vmem>>, vector<8x32xf32>
    %cst_14 = arith.constant dense<0.000000e+00> : vector<8x128xf32>
    %16 = tpu.matmul %15, %14, %cst_14 {dimension_numbers = #tpu.dot_dimension_numbers<[1], [0], [0], [1], [0, 0, 1, 1], [], []>} : vector<8x32xf32>, vector<32x128xf32>, vector<8x128xf32> -> vector<8x128xf32>
    %c0_15 = arith.constant 0 : index
    %c0_16 = arith.constant 0 : index
    %17 = vector.load %arg7[%c0_15, %c0_16] : memref<8x1xf32, #tpu.memory_space<vmem>>, vector<8x1xf32>
    %18 = vector.broadcast %17 : vector<8x1xf32> to vector<8x128xf32>
    %19 = arith.addf %16, %18 : vector<8x128xf32>
    %20 = tpu.transpose %19, [1, 0] : vector<8x128xf32> -> vector<128x8xf32>
    %c0_17 = arith.constant 0 : index
    %c0_18 = arith.constant 0 : index
    %21 = vector.load %arg8[%c0_17, %c0_18] : memref<128x8xf32, #tpu.memory_space<vmem>>, vector<128x8xf32>
    tpu.vector_store %arg8[%c0_17, %c0_18], %20 {strides = array<i32>} : memref<128x8xf32, #tpu.memory_space<vmem>>, vector<128x8xf32>,
    return
  }
  func.func @transform_0(%arg0: i32) -> (i32, i32) {
    %c0_i32 = arith.constant 0 : i32
    %c0_i32_0 = arith.constant 0 : i32
    return %arg0, %c0_i32 : i32, i32
  }
  func.func @transform_1(%arg0: i32) -> (i32, i32) {
    %c0_i32 = arith.constant 0 : i32
    %c0_i32_0 = arith.constant 0 : i32
    %c0_i32_1 = arith.constant 0 : i32
    return %c0_i32, %c0_i32_0 : i32, i32
  }
  func.func @transform_2(%arg0: i32) -> (i32, i32) {
    %c0_i32 = arith.constant 0 : i32
    %c0_i32_0 = arith.constant 0 : i32
    %c0_i32_1 = arith.constant 0 : i32
    return %c0_i32, %c0_i32_0 : i32, i32
  }
  func.func @transform_3(%arg0: i32) -> (i32, i32) {
    %c0_i32 = arith.constant 0 : i32
    %c0_i32_0 = arith.constant 0 : i32
    %c0_i32_1 = arith.constant 0 : i32
    return %c0_i32, %c0_i32_0 : i32, i32
  }
  func.func @transform_4(%arg0: i32) -> (i32, i32) {
    %c0_i32 = arith.constant 0 : i32
    %c0_i32_0 = arith.constant 0 : i32
    %c0_i32_1 = arith.constant 0 : i32
    return %c0_i32, %c0_i32_0 : i32, i32
  }
  func.func @transform_5(%arg0: i32) -> (i32, i32) {
    %c0_i32 = arith.constant 0 : i32
    %c0_i32_0 = arith.constant 0 : i32
    %c0_i32_1 = arith.constant 0 : i32
    return %c0_i32, %c0_i32_0 : i32, i32
  }
  func.func @transform_6(%arg0: i32) -> (i32, i32) {
    %c0_i32 = arith.constant 0 : i32
    %c0_i32_0 = arith.constant 0 : i32
    %c0_i32_1 = arith.constant 0 : i32
    return %c0_i32, %c0_i32_0 : i32, i32
  }
  func.func @transform_7(%arg0: i32) -> (i32, i32) {
    %c0_i32 = arith.constant 0 : i32
    %c0_i32_0 = arith.constant 0 : i32
    return %arg0, %c0_i32 : i32, i32
  }
}

</mosaic_0001>

<bundles_post_ra>
// kernel: tpu_custom_call.1
= control target key start
LH: loop header
LB: loop body
LE: loop exit
PB: predicated region body
PF: predicated region fallthrough
CT: control target
= control target key end

     0   :  { %vm70_vm0 = vcmask 130048   ;;  %v609_v2 = vmov 0   ;;  %vm248_vm1 = vcmask 261120   ;;  %v610_v50 = vmov 0.0   ;;  %s859_s0 = inlined_call_operand.vmem [shape: f32[128,16], index: 0, kind: input, shape index: {}]   ;;  %s860_s1 = inlined_call_operand.vmem [shape: f32[32,16], index: 1, kind: input, shape index: {}]   ;;  %s861_s2 = inlined_call_operand.vmem [shape: f32[32,1], index: 2, kind: input, shape index: {}]   ;;  %s862_s4 = inlined_call_operand.vmem [shape: f32[32,1], index: 4, kind: input, shape index: {}]   ;;  %s863_s6 = inlined_call_operand.vmem [shape: f32[8,1], index: 6, kind: input, shape index: {}]   ;;  %s864_s3 = inlined_call_operand.vmem [shape: f32[32,32], index: 3, kind: input, shape index: {}]   ;;  %s865_s5 = inlined_call_operand.vmem [shape: f32[8,32], index: 5, kind: input, shape index: {}]   ;;  %s866_s7 = inlined_call_operand.vmem [shape: f32[128,8], index: 7, kind: output, shape index: {}]  }
   0x1   :  { %v41_v0 = vld [vmem:[%s859_s0 + $0x78] sm:$0xff]  ;;  %v40_v1 = vld [vmem:[%s859_s0 + $0x70] sm:$0xff]  ;;  %607 = vset.pattern.permute.xlu0 %v609_v2  ;;  %608 = vset.pattern.permute.xlu1 %v609_v2  ;;  %v39_v3 = vld [vmem:[%s859_s0 + $0x68] sm:$0xff]  ;;  %vm611_vm2 = vmmov 0   ;;  %vm462_vm3 = vcmask 64512  }
   0x2   :  { %541 = vmatprep.subr.msk.mxu0 %vm70_vm0, %v41_v0  ;;  %v42_v4 = vld [vmem:[%s860_s1] sm:$0xff]  ;;  %v49_v5 = vld [vmem:[%s861_s2 + $0x18] sm:$0xff]  ;;  %v47_v6 = vld [vmem:[%s861_s2 + $0x8] sm:$0xff] }
   0x3   :  { %542 = vmatpush3.xpose.msk.msra.mxu0 %vm70_vm0, %v41_v0  ;;  %573 = vmatprep.mubr.msk.f32.mxu0 %vm70_vm0, %v42_v4  ;;  %v38_v7 = vld [vmem:[%s859_s0 + $0x60] sm:$0xff]  ;;  %v48_v8 = vld [vmem:[%s861_s2 + $0x10] sm:$0xff]  ;;  %v37_v10 = vld [vmem:[%s859_s0 + $0x58] sm:$0xff] }
   0x4   :  { %543 = vmatprep.subr.msk.mxu0 %vm70_vm0, %v40_v1  ;;  %67 = vperm.xlu0 %607, %v49_v5   ;;  %v46_v9 = vld [vmem:[%s861_s2] sm:$0xff]  ;;  %v227_v11 = vld [vmem:[%s862_s4 + $0x18] sm:$0xff]  ;;  %v226_v12 = vld [vmem:[%s862_s4 + $0x10] sm:$0xff] }
   0x5   :  { %57 = vperm.xlu1 %608, %v47_v6   ;;  %v36_v13 = vld [vmem:[%s859_s0 + $0x50] sm:$0xff]  ;;  %v225_v14 = vld [vmem:[%s862_s4 + $0x8] sm:$0xff]  ;;  %v224_v15 = vld [vmem:[%s862_s4] sm:$0xff] }
   0x6   :  { %v35_v16 = vld [vmem:[%s859_s0 + $0x48] sm:$0xff]  ;;  %v351_v17 = vld [vmem:[%s863_s6] sm:$0xff]  ;;  %v33_v19 = vld [vmem:[%s859_s0 + $0x38] sm:$0xff] }
   0x7   :  { %544 = vmatpush3.xpose.msk.msra.mxu0 %vm70_vm0, %v40_v1  ;;  %v34_v18 = vld [vmem:[%s859_s0 + $0x40] sm:$0xff]  ;;  %v32_v20 = vld [vmem:[%s859_s0 + $0x30] sm:$0xff]  ;;  %v31_v21 = vld [vmem:[%s859_s0 + $0x28] sm:$0xff] }
   0x8   :  { %545 = vmatprep.subr.msk.mxu0 %vm70_vm0, %v39_v3  ;;  %62 = vperm.xlu0 %607, %v48_v8   ;;  %v30_v22 = vld [vmem:[%s859_s0 + $0x20] sm:$0xff]  ;;  %v29_v23 = vld [vmem:[%s859_s0 + $0x18] sm:$0xff]  ;;  %v28_v24 = vld [vmem:[%s859_s0 + $0x10] sm:$0xff] }
   0x9   :  { %52 = vperm.xlu1 %608, %v46_v9   ;;  %v27_v25 = vld [vmem:[%s859_s0 + $0x8] sm:$0xff]  ;;  %v26_v26 = vld [vmem:[%s859_s0] sm:$0xff]  ;;  %v44_v28 = vld [vmem:[%s860_s1 + $0x10] sm:$0xff] }
   0xa   :  { %v43_v27 = vld [vmem:[%s860_s1 + $0x8] sm:$0xff]  ;;  %v45_v29 = vld [vmem:[%s860_s1 + $0x18] sm:$0xff]  ;;  %v220_v30 = vld [vmem:[%s864_s3] sm:$0xff] }
   0xb   :  { %546 = vmatpush3.xpose.msk.msra.mxu0 %vm70_vm0, %v39_v3  ;;  %587 = vmatprep.mubr.msk.f32.mxu1 %vm248_vm1, %v220_v30  ;;  %v221_v47 = vld [vmem:[%s864_s3 + $0x8] sm:$0xff]  ;;  %v222_v48 = vld [vmem:[%s864_s3 + $0x10] sm:$0xff]  ;;  %v223_v49 = vld [vmem:[%s864_s3 + $0x18] sm:$0xff] }
   0xc   :  { %547 = vmatprep.subr.msk.mxu0 %vm70_vm0, %v38_v7  ;;  %245 = vperm.xlu0 %607, %v227_v11   ;;  %v350_v3 = vld [vmem:[%s865_s5] sm:$0xff] }
   0xd   :  { %240 = vperm.xlu1 %608, %v226_v12  }
   0xf   :  { %548 = vmatpush3.xpose.msk.msra.mxu0 %vm70_vm0, %v38_v7 }
  0x10   :  { %549 = vmatprep.subr.msk.mxu0 %vm70_vm0, %v37_v10  ;;  %235 = vperm.xlu0 %607, %v225_v14  }
  0x11   :  { %230 = vperm.xlu1 %608, %v224_v15  }
  0x13   :  { %550 = vmatpush3.xpose.msk.msra.mxu0 %vm70_vm0, %v37_v10 }
  0x14   :  { %551 = vmatprep.subr.msk.mxu0 %vm70_vm0, %v36_v13  ;;  %354 = vperm.xlu0 %607, %v351_v17  }
  0x17   :  { %552 = vmatpush3.xpose.msk.msra.mxu0 %vm70_vm0, %v36_v13 }
  0x18   :  { %553 = vmatprep.subr.msk.mxu0 %vm70_vm0, %v35_v16 }
  0x1b   :  { %554 = vmatpush3.xpose.msk.msra.mxu0 %vm70_vm0, %v35_v16 }
  0x1c   :  { %555 = vmatprep.subr.msk.mxu0 %vm70_vm0, %v34_v18 }
  0x1f   :  { %556 = vmatpush3.xpose.msk.msra.mxu0 %vm70_vm0, %v34_v18 }
  0x20   :  { %557 = vmatprep.subr.msk.mxu0 %vm70_vm0, %v33_v19 }
  0x23   :  { %558 = vmatpush3.xpose.msk.msra.mxu0 %vm70_vm0, %v33_v19 }
  0x24   :  { %559 = vmatprep.subr.msk.mxu0 %vm70_vm0, %v32_v20 }
  0x27   :  { %560 = vmatpush3.xpose.msk.msra.mxu0 %vm70_vm0, %v32_v20 }
  0x28   :  { %561 = vmatprep.subr.msk.mxu0 %vm70_vm0, %v31_v21 }
  0x2b   :  { %562 = vmatpush3.xpose.msk.msra.mxu0 %vm70_vm0, %v31_v21 }
  0x2c   :  { %563 = vmatprep.subr.msk.mxu0 %vm70_vm0, %v30_v22 }
  0x2f   :  { %564 = vmatpush3.xpose.msk.msra.mxu0 %vm70_vm0, %v30_v22 }
  0x30   :  { %565 = vmatprep.subr.msk.mxu0 %vm70_vm0, %v29_v23 }
  0x33   :  { %566 = vmatpush3.xpose.msk.msra.mxu0 %vm70_vm0, %v29_v23 }
  0x34   :  { %567 = vmatprep.subr.msk.mxu0 %vm70_vm0, %v28_v24 }
  0x37   :  { %568 = vmatpush3.xpose.msk.msra.mxu0 %vm70_vm0, %v28_v24 }
  0x38   :  { %569 = vmatprep.subr.msk.mxu0 %vm70_vm0, %v27_v25 }
  0x3b   :  { %570 = vmatpush3.xpose.msk.msra.mxu0 %vm70_vm0, %v27_v25 }
  0x3c   :  { %571 = vmatprep.subr.msk.mxu0 %vm70_vm0, %v26_v26 }
  0x3f   :  { %572 = vmatpush3.xpose.msk.msra.mxu0 %vm70_vm0, %v26_v26 }
  0x42   :  { %574 = vmatmul.mubr.msk.f32.vlgmr.msra.gmra.mxu0 %vm70_vm0, %v43_v27 }
  0x43   :  { %576 = vmatprep.mubr.msk.f32.mxu0 %vm70_vm0, %v44_v28 }
  0x46   :  { %577 = vmatmul.mubr.msk.f32.gmra.mxu0 %vm70_vm0, %v45_v29 }
  0x7f   :  { %v68_v31 = vpop.permute.xlu0 %67 }
  0x80   :  { %v58_v33 = vpop.permute.xlu1 %57 }
  0x83   :  { %v63_v37 = vpop.permute.xlu0 %62 }
  0x84   :  { %v53_v42 = vpop.permute.xlu1 %52 }
  0x87   :  { %v246_v51 = vpop.permute.xlu0 %245 }
  0x88   :  { %v241_v53 = vpop.permute.xlu1 %240 }
  0x8b   :  { %v236_v57 = vpop.permute.xlu0 %235 }
  0x8c   :  { %v231_v62 = vpop.permute.xlu1 %230 }
  0x8f   :  { %v355_v4 = vpop.permute.xlu0 %354 }
 0x102   :  { %v575_v32 = vpop.f32.mrf.mxu0 }
 0x103   :  { %v203_v39 = vadd.f32 %v575_v32, %v58_v33 }
 0x104   :  { %v197_v34 = vpop.f32.mrf.mxu0 }
 0x105   :  { %v198_v43 = vadd.f32 %v197_v34, %v53_v42  ;;  %v217_v45 = vmax.f32 %v203_v39, 0.0 }
 0x106   :  { %v578_v35 = vpop.f32.mrf.mxu0 }
 0x107   :  { %v213_v36 = vadd.f32 %v578_v35, %v68_v31  ;;  %v216_v46 = vmax.f32 %v198_v43, 0.0 }
 0x108   :  { %v207_v38 = vpop.f32.mrf.mxu0 }
 0x109   :  { %v219_v40 = vmax.f32 %v213_v36, 0.0  ;;  %v208_v41 = vadd.f32 %v207_v38, %v63_v37 }
 0x10b   :  { %v218_v44 = vmax.f32 %v208_v41, 0.0  ;;  %579 = vmatprep.subr.mxu1 %v219_v40 }
 0x10c   :  { %580 = vmatpush3.msra.mxu1 %v219_v40 }
 0x10d   :  { %581 = vmatprep.subr.mxu1 %v218_v44 }
 0x10e   :  { %582 = vmatpush3.msra.mxu1 %v218_v44 }
 0x10f   :  { %583 = vmatprep.subr.mxu1 %v217_v45 }
 0x110   :  { %584 = vmatpush3.msra.mxu1 %v217_v45 }
 0x111   :  { %585 = vmatprep.subr.mxu1 %v216_v46 }
 0x112   :  { %586 = vmatpush3.msra.mxu1 %v216_v46 }
 0x113   :  { %588 = vmatmul.mubr.msk.f32.vlgmr.msra.gmra.mxu1 %vm248_vm1, %v221_v47  ;;  %593 = vmatprep.subr.mxu1 %v610_v50 }
 0x114   :  { %590 = vmatprep.mubr.msk.f32.mxu1 %vm248_vm1, %v222_v48 }
 0x117   :  { %591 = vmatmul.mubr.msk.f32.gmra.mxu1 %vm248_vm1, %v223_v49 }
 0x118   :  { %601 = vmatprep.mubr.msk.f32.mxu1 %vm611_vm2, %v610_v50 }
 0x1d3   :  { %v589_v52 = vpop.f32.mrf.mxu1 }
 0x1d4   :  { %v333_v59 = vadd.f32 %v589_v52, %v236_v57 }
 0x1d5   :  { %v327_v54 = vpop.f32.mrf.mxu1 }
 0x1d6   :  { %v328_v63 = vadd.f32 %v327_v54, %v231_v62  ;;  %v347_v1 = vmax.f32 %v333_v59, 0.0 }
 0x1d7   :  { %v592_v55 = vpop.f32.mrf.mxu1 }
 0x1d8   :  { %v343_v56 = vadd.f32 %v592_v55, %v246_v51  ;;  %v346_v2 = vmax.f32 %v328_v63, 0.0 }
 0x1d9   :  { %v337_v58 = vpop.f32.mrf.mxu1 }
 0x1da   :  { %v349_v60 = vmax.f32 %v343_v56, 0.0  ;;  %v338_v61 = vadd.f32 %v337_v58, %v241_v53 }
 0x1dc   :  { %v348_v0 = vmax.f32 %v338_v61, 0.0  ;;  %594 = vmatpush3.msra.mxu1 %v349_v60 }
 0x1dd   :  { %595 = vmatprep.subr.mxu1 %v610_v50 }
 0x1de   :  { %596 = vmatpush3.msra.mxu1 %v348_v0 }
 0x1df   :  { %597 = vmatprep.subr.mxu1 %v610_v50 }
 0x1e0   :  { %598 = vmatpush3.msra.mxu1 %v347_v1 }
 0x1e1   :  { %599 = vmatprep.subr.mxu1 %v610_v50 }
 0x1e2   :  { %600 = vmatpush3.msra.mxu1 %v346_v2 }
 0x1e3   :  { %602 = vmatmul.mubr.msk.f32.vlgmr.msra.gmra.mxu1 %vm248_vm1, %v350_v3 }
 0x2a3   :  { %v426_v5 = vpop.f32.mrf.mxu1 }
 0x2a4   :  { %v427_v6 = vadd.f32 %v426_v5, %v355_v4 }
 0x2a5   :  { %v603_v7 = vpop.f32.mrf.mxu1 }
 0x2a6   :  { %430 = vxpose.xlu1.b32.start.end [1/1] (short) %v427_v6, 128 }
 0x322   :  { %v446_v8 = vpop.trf.xlu1 }
 0x323   :  { %463 = vst.msk [vmem:[%s866_s7] sm:$0xff] %vm462_vm3, %v446_v8 }
 0x326   :  { %v447_v9 = vpop.trf.xlu1 }
 0x327   :  { %464 = vst.msk [vmem:[%s866_s7 + $0x8] sm:$0xff] %vm462_vm3, %v447_v9 }
 0x32a   :  { %v448_v10 = vpop.trf.xlu1 }
 0x32b   :  { %465 = vst.msk [vmem:[%s866_s7 + $0x10] sm:$0xff] %vm462_vm3, %v448_v10 }
 0x32e   :  { %v449_v11 = vpop.trf.xlu1 }
 0x32f   :  { %466 = vst.msk [vmem:[%s866_s7 + $0x18] sm:$0xff] %vm462_vm3, %v449_v11 }
 0x332   :  { %v450_v12 = vpop.trf.xlu1 }
 0x333   :  { %467 = vst.msk [vmem:[%s866_s7 + $0x20] sm:$0xff] %vm462_vm3, %v450_v12 }
 0x336   :  { %v451_v13 = vpop.trf.xlu1 }
 0x337   :  { %468 = vst.msk [vmem:[%s866_s7 + $0x28] sm:$0xff] %vm462_vm3, %v451_v13 }
 0x33a   :  { %v452_v14 = vpop.trf.xlu1 }
 0x33b   :  { %469 = vst.msk [vmem:[%s866_s7 + $0x30] sm:$0xff] %vm462_vm3, %v452_v14 }
 0x33e   :  { %v453_v15 = vpop.trf.xlu1 }
 0x33f   :  { %470 = vst.msk [vmem:[%s866_s7 + $0x38] sm:$0xff] %vm462_vm3, %v453_v15 }
 0x342   :  { %v454_v16 = vpop.trf.xlu1 }
 0x343   :  { %471 = vst.msk [vmem:[%s866_s7 + $0x40] sm:$0xff] %vm462_vm3, %v454_v16 }
 0x346   :  { %v455_v17 = vpop.trf.xlu1 }
 0x347   :  { %472 = vst.msk [vmem:[%s866_s7 + $0x48] sm:$0xff] %vm462_vm3, %v455_v17 }
 0x34a   :  { %v456_v18 = vpop.trf.xlu1 }
 0x34b   :  { %473 = vst.msk [vmem:[%s866_s7 + $0x50] sm:$0xff] %vm462_vm3, %v456_v18 }
 0x34e   :  { %v457_v19 = vpop.trf.xlu1 }
 0x34f   :  { %474 = vst.msk [vmem:[%s866_s7 + $0x58] sm:$0xff] %vm462_vm3, %v457_v19 }
 0x352   :  { %v458_v20 = vpop.trf.xlu1 }
 0x353   :  { %475 = vst.msk [vmem:[%s866_s7 + $0x60] sm:$0xff] %vm462_vm3, %v458_v20 }
 0x356   :  { %v459_v21 = vpop.trf.xlu1 }
 0x357   :  { %476 = vst.msk [vmem:[%s866_s7 + $0x68] sm:$0xff] %vm462_vm3, %v459_v21 }
 0x35a   :  { %v460_v22 = vpop.trf.xlu1 }
 0x35b   :  { %477 = vst.msk [vmem:[%s866_s7 + $0x70] sm:$0xff] %vm462_vm3, %v460_v22 }
 0x35e   :  { %v461_v23 = vpop.trf.xlu1 }
 0x35f   :  { %478 = vst.msk [vmem:[%s866_s7 + $0x78] sm:$0xff] %vm462_vm3, %v461_v23 }

</bundles_post_ra>
